<compile_context>
chip_gen: v7x
topology: tpu7x:2x2x1
jax: 0.10.0
libtpu: 0.0.40
codegen_flags: <defaults>
</compile_context>

<pallas_src>
import functools

import jax
import jax.numpy as jnp
from jax.experimental import pallas as pl
from jax.experimental.pallas import tpu as pltpu


def _round_up(x, m):
    return ((x + m - 1) // m) * m


def _layernorm_kernel(x_ref, g_ref, o_ref, *, eps, valid_cols):
    # Per-row mean/var reduction over the channel (lane) axis + scale.
    x = x_ref[...]                                        # (TB, Cp), input dtype
    xf = x.astype(jnp.float32)
    inv_n = jnp.float32(1.0 / valid_cols)
    # Padded lanes of x are zero, so the sum over all lanes == sum over valid lanes.
    mean = jnp.sum(xf, axis=-1, keepdims=True) * inv_n    # (TB, 1)
    centered = xf - mean
    if valid_cols != xf.shape[-1]:
        lane = jax.lax.broadcasted_iota(jnp.int32, xf.shape, 1)
        centered = jnp.where(lane < valid_cols, centered, 0.0)
    var = jnp.sum(centered * centered, axis=-1, keepdims=True) * inv_n  # unbiased=False
    inv_std = jax.lax.rsqrt(jnp.maximum(var, jnp.float32(eps)))  # clamp(min=eps).rsqrt()
    # g_ref is already f32, (1, Cp): lane-aligned broadcast over rows.
    o_ref[...] = (centered * inv_std * g_ref[...]).astype(o_ref.dtype)


def layer_norm(x, g, *, block_rows=None):
    """x: (B, C), g: (C,). Returns (B, C) with the module's forward semantics."""
    B, C = x.shape
    assert g.shape == (C,), f"g must have shape ({C},), got {g.shape}"

    # eps depends on input dtype, exactly as in the PyTorch module.
    eps = 1e-5 if x.dtype == jnp.float32 else 1e-3

    itemsize = jnp.dtype(x.dtype).itemsize
    sublane = max(8, 32 // itemsize)      # 8 for f32, 16 for bf16, 32 for 8-bit
    C_pad = _round_up(C, 128)             # lane-dense last dim -> unmasked vst

    if block_rows is None:
        # ~2 MiB of f32-equivalent per x block: big enough to sit near the HBM
        # roofline, small enough that double-buffered x + out + f32 temporaries
        # fit every generation's scoped VMEM (incl. v7x) with headroom, and large
        # B still yields a long "parallel" grid for megacore sharding.
        target_f32_bytes = 2 * 1024 * 1024
        block_rows = max(sublane, (target_f32_bytes // (C_pad * 4)) // sublane * sublane)
    block_rows = _round_up(block_rows, sublane)
    block_rows = min(block_rows, _round_up(B, sublane))

    B_pad = _round_up(B, block_rows)      # ragged B: pad instead of asserting
    grid = (B_pad // block_rows,)

    xp = x
    if (B_pad, C_pad) != (B, C):
        xp = jnp.pad(x, ((0, B_pad - B), (0, C_pad - C)))
    # Pre-cast gain to f32 and pad; padded lanes are zero (output there is discarded).
    gp = jnp.pad(g.astype(jnp.float32), (0, C_pad - C)).reshape(1, C_pad)

    kernel = functools.partial(_layernorm_kernel, eps=eps, valid_cols=C)

    out = pl.pallas_call(
        kernel,
        out_shape=jax.ShapeDtypeStruct((B_pad, C_pad), x.dtype),
        grid_spec=pltpu.PrefetchScalarGridSpec(
            num_scalar_prefetch=0,
            grid=grid,
            in_specs=[
                pl.BlockSpec((block_rows, C_pad), lambda i: (i, 0)),  # x row-tile
                pl.BlockSpec((1, C_pad), lambda i: (0, 0)),           # g (resident)
            ],
            out_specs=pl.BlockSpec((block_rows, C_pad), lambda i: (i, 0)),
        ),
        compiler_params=pltpu.CompilerParams(
            dimension_semantics=("parallel",),
            vmem_limit_bytes=32 * 1024 * 1024,
        ),
    )(xp, gp)

    if (B_pad, C_pad) != (B, C):
        out = out[:B, :C]
    return out


def _reference(x, g, eps):
    xf = x.astype(jnp.float32)
    mean = jnp.mean(xf, axis=1, keepdims=True)
    var = jnp.mean((xf - mean) ** 2, axis=1, keepdims=True)
    out = (xf - mean) * jax.lax.rsqrt(jnp.maximum(var, eps)) * g.astype(jnp.float32)
    return out.astype(x.dtype)


if __name__ == "__main__":
    key = jax.random.PRNGKey(0)
    k1, k2, k3 = jax.random.split(key, 3)

    # Test 1: f32, small channel dim not a multiple of 128 (exercises lane padding
    # + masked variance).  g = ones, exactly as the module's init.
    B1, C1 = 8, 32
    x1 = jax.random.normal(k1, (B1, C1), dtype=jnp.float32)
    g1 = jnp.ones((C1,), dtype=jnp.float32)
    out1 = jax.block_until_ready(layer_norm(x1, g1))
    ref1 = _reference(x1, g1, eps=1e-5)
    assert out1.shape == (B1, C1) and out1.dtype == x1.dtype
    assert jnp.max(jnp.abs(out1 - ref1)) < 1e-4, "f32 mismatch vs reference"

    # Test 2: bf16 (eps = 1e-3 path), ragged B (exercises row padding), learned g.
    B2, C2 = 10, 128
    x2 = jax.random.normal(k2, (B2, C2), dtype=jnp.bfloat16)
    g2 = (1.0 + 0.1 * jax.random.normal(k3, (C2,), dtype=jnp.float32)).astype(jnp.bfloat16)
    out2 = jax.block_until_ready(layer_norm(x2, g2))
    ref2 = _reference(x2, g2, eps=1e-3)
    assert out2.shape == (B2, C2) and out2.dtype == x2.dtype
    err = jnp.max(jnp.abs(out2.astype(jnp.float32) - ref2.astype(jnp.float32)))
    assert err < 3e-2, "bf16 mismatch vs reference"

    print("KERNEL_OK")
</pallas_src>

<mosaic_0001>
module attributes {stable_mosaic.version = 11 : i64} {
  func.func @_layernorm_kernel(%arg0: i32, %arg1: memref<8x128xf32, #tpu.memory_space<vmem>>, %arg2: memref<1x128xf32, #tpu.memory_space<vmem>>, %arg3: memref<8x128xf32, #tpu.memory_space<vmem>>) attributes {dimension_semantics = [#tpu.dimension_semantics<parallel>], iteration_bounds = array<i64: 1>, scalar_prefetch = 0 : i64, scratch_operands = 0 : i64, tpu.core_type = #tpu.core_type<tc>, window_params = [{transform_indices = @transform_0, window_bounds = array<i64: 8, 128>}, {pipeline_mode = #tpu.pipeline_mode<synchronous>, transform_indices = @transform_1, window_bounds = array<i64: 1, 128>}, {transform_indices = @transform_2, window_bounds = array<i64: 8, 128>}]} {
    %c0 = arith.constant 0 : index
    %c0_0 = arith.constant 0 : index
    %0 = vector.load %arg1[%c0, %c0_0] : memref<8x128xf32, #tpu.memory_space<vmem>>, vector<8x128xf32>
    %cst = arith.constant dense<0.000000e+00> : vector<8xf32>
    %1 = vector.multi_reduction <add>, %0, %cst [1] : vector<8x128xf32> to vector<8xf32>
    %2 = vector.shape_cast %1 : vector<8xf32> to vector<8x1xf32>
    %cst_1 = arith.constant 3.125000e-02 : f32
    %3 = vector.broadcast %cst_1 : f32 to vector<8x1xf32>
    %4 = arith.mulf %2, %3 : vector<8x1xf32>
    %5 = vector.broadcast %4 : vector<8x1xf32> to vector<8x128xf32>
    %6 = arith.subf %0, %5 : vector<8x128xf32>
    %7 = tpu.iota {dimensions = array<i32: 1>} : vector<8x128xi32>
    %c32_i32 = arith.constant 32 : i32
    %8 = vector.broadcast %c32_i32 : i32 to vector<8x128xi32>
    %9 = arith.cmpi slt, %7, %8 : vector<8x128xi32>
    %cst_2 = arith.constant 0.000000e+00 : f32
    %10 = vector.broadcast %cst_2 : f32 to vector<8x128xf32>
    %11 = arith.select %9, %6, %10 : vector<8x128xi1>, vector<8x128xf32>
    %12 = arith.mulf %11, %11 : vector<8x128xf32>
    %cst_3 = arith.constant dense<0.000000e+00> : vector<8xf32>
    %13 = vector.multi_reduction <add>, %12, %cst_3 [1] : vector<8x128xf32> to vector<8xf32>
    %14 = vector.shape_cast %13 : vector<8xf32> to vector<8x1xf32>
    %cst_4 = arith.constant 3.125000e-02 : f32
    %15 = vector.broadcast %cst_4 : f32 to vector<8x1xf32>
    %16 = arith.mulf %14, %15 : vector<8x1xf32>
    %cst_5 = arith.constant 9.99999974E-6 : f32
    %17 = vector.broadcast %cst_5 : f32 to vector<8x1xf32>
    %18 = arith.maximumf %16, %17 : vector<8x1xf32>
    %19 = math.rsqrt %18 : vector<8x1xf32>
    %20 = vector.broadcast %19 : vector<8x1xf32> to vector<8x128xf32>
    %21 = arith.mulf %11, %20 : vector<8x128xf32>
    %c0_6 = arith.constant 0 : index
    %c0_7 = arith.constant 0 : index
    %22 = vector.load %arg2[%c0_6, %c0_7] : memref<1x128xf32, #tpu.memory_space<vmem>>, vector<1x128xf32>
    %23 = vector.broadcast %22 : vector<1x128xf32> to vector<8x128xf32>
    %24 = arith.mulf %21, %23 : vector<8x128xf32>
    %c0_8 = arith.constant 0 : index
    %c0_9 = arith.constant 0 : index
    %25 = vector.load %arg3[%c0_8, %c0_9] : memref<8x128xf32, #tpu.memory_space<vmem>>, vector<8x128xf32>
    tpu.vector_store %arg3[%c0_8, %c0_9], %24 {strides = array<i32>} : memref<8x128xf32, #tpu.memory_space<vmem>>, vector<8x128xf32>,
    return
  }
  func.func @transform_0(%arg0: i32) -> (i32, i32) {
    %c0_i32 = arith.constant 0 : i32
    %c0_i32_0 = arith.constant 0 : i32
    return %arg0, %c0_i32 : i32, i32
  }
  func.func @transform_1(%arg0: i32) -> (i32, i32) {
    %c0_i32 = arith.constant 0 : i32
    %c0_i32_0 = arith.constant 0 : i32
    %c0_i32_1 = arith.constant 0 : i32
    return %c0_i32, %c0_i32_0 : i32, i32
  }
  func.func @transform_2(%arg0: i32) -> (i32, i32) {
    %c0_i32 = arith.constant 0 : i32
    %c0_i32_0 = arith.constant 0 : i32
    return %arg0, %c0_i32 : i32, i32
  }
}

</mosaic_0001>

<bundles_post_ra>
// kernel: tpu_custom_call.1
= control target key start
LH: loop header
LB: loop body
LE: loop exit
PB: predicated region body
PF: predicated region fallthrough
CT: control target
= control target key end

     0   :  { %7 = vsyncpa [#allocation3], 0  ;;  %s161_s0 = inlined_call_operand.hbm [shape: f32[8,128], index: 0, kind: input, shape index: {}]   ;;  %s162_s1 = inlined_call_operand.vmem [shape: f32[1,128], index: 1, kind: input, shape index: {}]   ;;  %s163_s2 = inlined_call_operand.hbm [shape: f32[8,128], index: 2, kind: output, shape index: {}]  }
   0x1   :  { %8 = vsyncpa [#allocation4], 0  ;;  %s117_s9 = smov [#allocation2]   ;;  %s69_s13 = scalar_lea.hbm %s161_s0, 128 }
   0x2   :  { %s15_s10 = sshll.u32 %s117_s9, 4  ;;  %p70_p0 = scmp.ne.s32.totalorder %s161_s0, %s69_s13  ;;  %s16_s10 = int_to_ptr.vmem [resolvable:$true] %s15_s10 }
   0x3   :  { %p73_p1 = scmp.lt.u32.totalorder %s69_s13, %s161_s0 }
   0x5   :  { %p75_p2 = pnand %p73_p1, %p70_p0 }
   0x7   :  { %78 = shalt.err (!%p75_p2)
}
   0x8   :  { %s79_s18 = scalar_lea.vmem %s16_s10, 128  ;;  %p84_p4 = scmp.lt.s32.totalorder %s16_s10, %s16_s10 }
   0x9   :  { %p80_p3 = scmp.ne.s32.totalorder %s16_s10, %s79_s18  ;;  %p85_p5 = scmp.lt.s32.totalorder %s79_s18, %s79_s18 }
   0xb   :  { %p86_p6 = por %p85_p5, %p84_p4 }
   0xd   :  { %p87_p7 = pnand %p86_p6, %p80_p3 }
   0xf   :  { %90 = shalt.err (!%p87_p7)
}
  0x10   :  { %18 = dma.hbm_to_vmem [thread:$0]  %s161_s0, 128, %s16_s10, [#allocation3]  }
  0x11   :  { %113 = dma.done.wait [#allocation3], 128  }
  0x12   :  { %114 = vsyncadd [#allocation3], 4294967168  ;;  %v24_v0 = vld [vmem:[#allocation2] sm:$0xff]  ;;  %v29_v1 = vlaneseq  ;;  %s118_s22 = smov [#allocation5]  }
  0x13   :  { %25 = vadd.xlane.f32.xlu0 %v24_v0  ;;  %v64_v12 = vld [vmem:[%s162_s1] ss:$0 sm:$0xff]  ;;  %s55_s23 = sshll.u32 %s118_s22, 4  ;;  %s56_s23 = int_to_ptr.vmem [resolvable:$true] %s55_s23 }
  0x14   :  { %v30_v2 = vand.u32 127, %v29_v1  ;;  %s91_s24 = scalar_lea.vmem %s56_s23, 128  ;;  %p96_p9 = scmp.lt.s32.totalorder %s56_s23, %s56_s23 }
  0x15   :  { %p92_p8 = scmp.ne.s32.totalorder %s56_s23, %s91_s24  ;;  %p97_p10 = scmp.lt.s32.totalorder %s91_s24, %s91_s24 }
  0x16   :  { %vm31_vm0 = vcmp.lt.s32.totalorder %v30_v2, 32 }
  0x17   :  { %p98_p11 = por %p97_p10, %p96_p9 }
  0x19   :  { %p99_p12 = pnand %p98_p11, %p92_p8 }
  0xa0   :  { %v26_v3 = vpop.xlane.xlu0 %25 }
  0xa1   :  { %v27_v4 = vmul.f32 0.03125, %v26_v3 }
  0xa3   :  { %v28_v5 = vsub.f32 %v24_v0, %v27_v4 }
  0xa5   :  { %v32_v6 = vsel %vm31_vm0, %v28_v5, 0.0 }
  0xa6   :  { %v33_v7 = vmul.f32 %v32_v6, %v32_v6 }
  0xa8   :  { %34 = vadd.xlane.f32.xlu0 %v33_v7 }
 0x135   :  { %v35_v8 = vpop.xlane.xlu0 %34 }
 0x136   :  { %v36_v9 = vmul.f32 0.03125, %v35_v8 }
 0x138   :  { %v37_v10 = vmax.f32 %v36_v9, 1e-05 }
 0x13a   :  { %67 = vrsqrt.f32 %v37_v10 }
 0x144   :  { %v68_v11 = vpop.eup %67 }
 0x145   :  { %v39_v13 = vmul.f32 %v68_v11, %v32_v6 }
 0x147   :  { %v47_v14 = vmul.f32 %v64_v12, %v39_v13 }
 0x149   :  { %48 = vst [vmem:[#allocation5] sm:$0xff] %v47_v14 }
 0x14a   :  { %102 = shalt.err (!%p99_p12)
}
 0x14b   :  { %s103_s27 = scalar_lea.hbm %s163_s2, 128 }
 0x14c   :  { %p104_p13 = scmp.ne.s32.totalorder %s163_s2, %s103_s27  ;;  %p107_p0 = scmp.lt.u32.totalorder %s103_s27, %s163_s2 }
 0x14e   :  { %p109_p1 = pnand %p107_p0, %p104_p13 }
 0x150   :  { %112 = shalt.err (!%p109_p1)
}
 0x151   :  { %58 = dma.vmem_to_hbm [thread:$0]  %s56_s23, 128, %s163_s2, [#allocation4]  }
 0x152   :  { %115 = dma.done.wait [#allocation4], 128  }
 0x153   :  { %116 = vsyncadd [#allocation4], 4294967168 }
 0x154   :  { %62 = vsyncpa [#allocation3], 1 }
 0x155   :  { %63 = vsyncpa [#allocation4], 1 }

</bundles_post_ra>
